<compile_context>
chip_gen: v7x
topology: tpu7x:2x2x1
jax: 0.10.0
libtpu: 0.0.40
codegen_flags: <defaults>
</compile_context>

<pallas_src>
import functools

import jax
import jax.numpy as jnp
import numpy as np
from jax.experimental import pallas as pl
from jax.experimental.pallas import tpu as pltpu

SELU_ALPHA = 1.6732632423543772
SELU_SCALE = 1.0507009873554805


def _round_up(v, m):
    return (v + m - 1) // m * m


def _matmul_selu_kernel(lhs_ref, rhs_ref, out_ref, acc_ref):
    """One (TR, TL) tile of SELU(LHS @ RHS); K tiled on grid axis 2 ("arbitrary")."""
    k = pl.program_id(2)

    @pl.when(k == 0)
    def _():
        acc_ref[...] = jnp.zeros_like(acc_ref)

    acc_ref[...] += jnp.dot(lhs_ref[...], rhs_ref[...],
                            preferred_element_type=jnp.float32)

    @pl.when(k == pl.num_programs(2) - 1)
    def _():
        v = acc_ref[...]                                    # bias already folded in
        neg = SELU_ALPHA * (jnp.exp(jnp.minimum(v, 0.0)) - 1.0)
        out_ref[...] = (SELU_SCALE * jnp.where(v > 0.0, v, neg)).astype(out_ref.dtype)


def precompute_gnn_extrapolation(nearest_nodes, nearest_dists, W, b, n_heads, sigma,
                                 *, t_in, n_nodes, batch_size, n_channels,
                                 tk_cap=1024, tr_cap=256, tl_cap=512):
    """Static (x-independent) preprocessing — run once at module init."""
    t_out = int(W.shape[0])
    M = n_nodes + 1                         # extra zero node for -1 neighbours
    K = t_in * M
    Nout = t_out * n_nodes
    R = batch_size * n_channels

    # ---- per-head neighbour weights (scatter-add, no dense one_hot) --------
    lam = jnp.arange(1, n_heads + 1, dtype=jnp.float32) / n_heads            # (H,)
    d = nearest_dists.astype(jnp.float32)                                    # (N,k+1)
    nn = nearest_nodes.astype(jnp.int32)                                     # (N,k+1)
    w_agg = jnp.exp(-(d[..., None] ** 2) * lam / (sigma ** 2))               # (N,k+1,H)
    w_agg = jnp.where(nn[..., None] == -1, 0.0, w_agg)
    w_agg = jnp.where(w_agg < 1e-8, 0.0, w_agg)
    idx = jnp.where(nn < 0, n_nodes, nn)                                     # -1 -> pad node

    # A[n, m, h] = sum_j [idx[n,j]==m] * w_agg[n,j,h]
    A = jnp.zeros((n_nodes, M, n_heads), jnp.float32)
    A = A.at[jnp.arange(n_nodes)[:, None], idx, :].add(w_agg)                # (N,M,H)

    # Fold shrink:  WAT[t*M+m, o*N+n] = sum_h W[o, t*H+h] * A[n, m, h]
    Wr = W.astype(jnp.float32).reshape(t_out, t_in, n_heads)
    WAT = jnp.einsum('oth,nmh->tmon', Wr, A).reshape(K, Nout)                # (K, Nout)
    bias_col = jnp.repeat(b.astype(jnp.float32), n_nodes)                    # (Nout,)

    # ---- GEMM orientation: stream the larger dim through the MXU rows ------
    transpose_gemm = (R < 128) and (Nout > R)
    rows, lanes = (Nout, R) if transpose_gemm else (R, Nout)

    # ---- hardware tiling ----------------------------------------------------
    K_aug = K + 1                           # extra ones/bias column folds the bias in
    Kp = _round_up(K_aug, 128)
    TK = Kp if Kp <= tk_cap else tk_cap
    Kp = _round_up(Kp, TK)

    Rp = _round_up(rows, 8)
    TR = Rp if Rp <= tr_cap else tr_cap
    Rp = _round_up(Rp, TR)

    Lp = _round_up(lanes, 128)
    TL = tl_cap                              # 512 cap is safe for v7x's 64 MiB VMEM
    while TL > 128 and Lp < 2 * TL:          # prefer >=2 lane tiles (v7x has 2 TCs)
        TL //= 2
    Lp = _round_up(Lp, TL)

    if (Rp // TR) * (Lp // TL) < 2 and Rp >= 16:
        TR = _round_up(Rp // 2, 8)           # split rows so the 2nd core gets work
        Rp = _round_up(Rp, TR)

    # Keep the bigger operand resident across the inner parallel axis
    # (both share the K factor, so compare the non-K extents).
    rhs_resident = bool(lanes >= rows)

    # ---- folded static operand: augmented, padded, bf16 --------------------
    if transpose_gemm:
        static_op = jnp.concatenate([WAT.T, bias_col[:, None]], axis=1)      # (Nout,K+1)
        wat_op = jnp.pad(static_op, ((0, Rp - Nout), (0, Kp - K_aug)))
    else:
        static_op = jnp.concatenate([WAT, bias_col[None, :]], axis=0)        # (K+1,Nout)
        wat_op = jnp.pad(static_op, ((0, Kp - K_aug), (0, Lp - Nout)))
    wat_op = wat_op.astype(jnp.bfloat16)

    # ---- explicit VMEM budget (generation aware) ----------------------------
    need = 2 * 2 * TK * (TR + TL) + 4 * TR * TL + 2 * 4 * TR * TL
    vmem_cap = 64 << 20                      # conservative default (v7x physical)
    try:
        info = pltpu.get_tpu_info()
        vmem_cap = int(getattr(info, "vmem_capacity_bytes", vmem_cap))
    except Exception:
        pass
    vmem_limit = int(min(max(4 * need, 32 << 20), (3 * vmem_cap) // 4))

    return dict(wat_op=wat_op, transpose_gemm=bool(transpose_gemm),
                rhs_resident=rhs_resident, R=R, Nout=Nout, t_out=t_out,
                n_nodes=n_nodes, t_in=t_in, K=K, K_aug=K_aug, Kp=Kp,
                Rp=Rp, Lp=Lp, TR=TR, TL=TL, TK=TK, vmem_limit=vmem_limit)


def gnn_extrapolation_forward(x, params):
    """y = SELU(shrink(gcn_aggregation(x)));  returns concat([x, y], time axis)."""
    p = params
    B, t_in, n_nodes, n_ch = x.shape
    R, K, Kp = p['R'], p['K'], p['Kp']
    assert t_in == p['t_in'] and n_nodes == p['n_nodes'] and B * n_ch == R

    # zero-pad node axis (index n_nodes is the "missing neighbour" node)
    xpad = jnp.concatenate([x, jnp.zeros_like(x[:, :, :1])], axis=2)         # (B,t,M,C)

    if p['transpose_gemm']:
        # RHS[(t*M+m), (b*C+c)] = pad_x[b,t,m,c]; trailing ones row folds the bias.
        xop = jnp.transpose(xpad, (1, 2, 0, 3)).reshape(K, R).astype(jnp.float32)
        xop = jnp.concatenate([xop, jnp.ones((1, R), jnp.float32)], axis=0)
        rhs = jnp.pad(xop, ((0, Kp - p['K_aug']), (0, p['Lp'] - R))).astype(jnp.bfloat16)
        lhs = p['wat_op']
    else:
        # LHS[(b*C+c), (t*M+m)] = pad_x[b,t,m,c]; trailing ones column folds the bias.
        xop = jnp.transpose(xpad, (0, 3, 1, 2)).reshape(R, K).astype(jnp.float32)
        xop = jnp.concatenate([xop, jnp.ones((R, 1), jnp.float32)], axis=1)
        lhs = jnp.pad(xop, ((0, p['Rp'] - R), (0, Kp - p['K_aug']))).astype(jnp.bfloat16)
        rhs = p['wat_op']

    NI, NJ, NK = p['Rp'] // p['TR'], p['Lp'] // p['TL'], Kp // p['TK']
    if p['rhs_resident']:
        # j outermost, i inner -> RHS column-strip stays resident across i (NK==1 case).
        grid = (NJ, NI, NK)
        lhs_spec = pl.BlockSpec((p['TR'], p['TK']), lambda j, i, k: (i, k))
        rhs_spec = pl.BlockSpec((p['TK'], p['TL']), lambda j, i, k: (k, j))
        out_spec = pl.BlockSpec((p['TR'], p['TL']), lambda j, i, k: (i, j))
    else:
        # i outermost, j inner -> LHS row-strip stays resident across j.
        grid = (NI, NJ, NK)
        lhs_spec = pl.BlockSpec((p['TR'], p['TK']), lambda i, j, k: (i, k))
        rhs_spec = pl.BlockSpec((p['TK'], p['TL']), lambda i, j, k: (k, j))
        out_spec = pl.BlockSpec((p['TR'], p['TL']), lambda i, j, k: (i, j))

    out = pl.pallas_call(
        _matmul_selu_kernel,
        out_shape=jax.ShapeDtypeStruct((p['Rp'], p['Lp']), jnp.float32),
        grid=grid,
        in_specs=[lhs_spec, rhs_spec],
        out_specs=out_spec,
        scratch_shapes=[pltpu.VMEM((p['TR'], p['TL']), jnp.float32)],
        compiler_params=pltpu.CompilerParams(
            dimension_semantics=("parallel", "parallel", "arbitrary"),
            vmem_limit_bytes=p['vmem_limit']),
    )(lhs, rhs)

    t_out = p['t_out']
    if p['transpose_gemm']:
        y = out[:p['Nout'], :R].reshape(t_out, n_nodes, B, n_ch)
        y = jnp.transpose(y, (2, 0, 1, 3))                                   # (B,to,N,C)
    else:
        y = out[:R, :p['Nout']].reshape(B, n_ch, t_out, n_nodes)
        y = jnp.transpose(y, (0, 2, 3, 1))                                   # (B,to,N,C)
    return jnp.concatenate([x, y.astype(x.dtype)], axis=1)


def reference_forward(x, nearest_nodes, nearest_dists, W, b, n_heads, sigma):
    """Pure-JAX transcription of the PyTorch forward, used only for checking."""
    B, t_in, n_nodes, C = x.shape
    kp1 = nearest_nodes.shape[1]
    pad_x = jnp.concatenate([x, jnp.zeros_like(x[:, :, :1])], axis=2)
    lam = jnp.arange(1, n_heads + 1, dtype=jnp.float32) / n_heads
    d = nearest_dists.reshape(-1)
    nn_flat = nearest_nodes.reshape(-1)
    w = jnp.exp(-(d[:, None] ** 2) * lam / (sigma ** 2))
    w = jnp.where(nn_flat[:, None] == -1, 0.0, w)
    w = jnp.where(w < 1e-8, 0.0, w)
    idx = jnp.where(nn_flat < 0, n_nodes, nn_flat)
    gathered = pad_x[:, :, idx, :]                                        # (B,t,N*kp1,C)
    agg = gathered[:, :, :, None, :] * w[None, None, :, :, None]          # (B,t,N*kp1,H,C)
    agg = agg.reshape(B, t_in, n_nodes, kp1, n_heads, C).sum(3)           # (B,t,N,H,C)
    feat = jnp.transpose(agg, (0, 2, 4, 1, 3)).reshape(B, n_nodes, C, t_in * n_heads)
    y = feat @ W.T + b
    y = jnp.transpose(y, (0, 3, 1, 2))                                    # (B,T-t,N,C)
    y = jax.nn.selu(y)
    return jnp.concatenate([x, y], axis=1)


if __name__ == "__main__":
    key = jax.random.PRNGKey(0)
    B, t_in, T, n_nodes, n_ch, n_heads, k = 2, 8, 12, 16, 4, 4, 3
    kx, kw, kb, kn, kd = jax.random.split(key, 5)

    x = jax.random.normal(kx, (B, t_in, n_nodes, n_ch), jnp.float32)

    # neighbour table: column 0 = self, rest random; inject a couple of -1 (missing)
    self_idx = jnp.arange(n_nodes, dtype=jnp.int32)[:, None]
    rand_nb = jax.random.randint(kn, (n_nodes, k), 0, n_nodes, dtype=jnp.int32)
    nearest_nodes = jnp.concatenate([self_idx, rand_nb], axis=1)
    nearest_nodes = nearest_nodes.at[0, k].set(-1).at[3, 1].set(-1)
    dists = jax.random.uniform(kd, (n_nodes, k), jnp.float32, 0.1, 2.0)
    nearest_dists = jnp.concatenate([jnp.zeros((n_nodes, 1), jnp.float32), dists], axis=1)

    sigma_ratio = 4.0                                    # constructor arg of the module
    sigma = float(jnp.max(nearest_dists)) / sigma_ratio  # self.sigma

    # shrink = nn.Linear(t_in * n_heads, T - t_in), deterministic uniform init
    fan_in = t_in * n_heads
    bound = 1.0 / np.sqrt(fan_in)
    W = jax.random.uniform(kw, (T - t_in, fan_in), jnp.float32, -bound, bound)
    b = jax.random.uniform(kb, (T - t_in,), jnp.float32, -bound, bound)

    # static preprocessing hoisted out of the forward (done once at "init")
    params = precompute_gnn_extrapolation(
        nearest_nodes, nearest_dists, W, b, n_heads, sigma,
        t_in=t_in, n_nodes=n_nodes, batch_size=B, n_channels=n_ch)

    fwd = jax.jit(functools.partial(gnn_extrapolation_forward, params=params))
    out = jax.block_until_ready(fwd(x))

    ref = reference_forward(x, nearest_nodes, nearest_dists, W, b, n_heads, sigma)
    np.testing.assert_allclose(np.asarray(out), np.asarray(ref), rtol=2e-2, atol=2e-2)
    assert out.shape == (B, T, n_nodes, n_ch)
    print("KERNEL_OK")
</pallas_src>

<mosaic_0001>
module attributes {stable_mosaic.version = 11 : i64} {
  func.func @_matmul_selu_kernel(%arg0: i32, %arg1: i32, %arg2: i32, %arg3: memref<32x256xbf16, #tpu.memory_space<vmem>>, %arg4: memref<256x128xbf16, #tpu.memory_space<vmem>>, %arg5: memref<32x128xf32, #tpu.memory_space<vmem>>, %arg6: memref<32x128xf32, #tpu.memory_space<vmem>>) attributes {dimension_semantics = [#tpu.dimension_semantics<parallel>, #tpu.dimension_semantics<parallel>, #tpu.dimension_semantics<arbitrary>], iteration_bounds = array<i64: 2, 1, 1>, scalar_prefetch = 0 : i64, scratch_operands = 1 : i64, tpu.core_type = #tpu.core_type<tc>, window_params = [{transform_indices = @transform_0, window_bounds = array<i64: 32, 256>}, {transform_indices = @transform_1, window_bounds = array<i64: 256, 128>}, {transform_indices = @transform_2, window_bounds = array<i64: 32, 128>}]} {
    %c0_i32 = arith.constant 0 : i32
    %0 = arith.cmpi eq, %arg2, %c0_i32 : i32
    %1 = arith.extui %0 : i1 to i32
    %c0_i32_0 = arith.constant 0 : i32
    %2 = arith.cmpi ne, %1, %c0_i32_0 : i32
    scf.if %2 {
      %cst_10 = arith.constant 0.000000e+00 : f32
      %12 = vector.broadcast %cst_10 : f32 to vector<32x128xf32>
      %c0_11 = arith.constant 0 : index
      %c0_12 = arith.constant 0 : index
      %13 = vector.load %arg6[%c0_11, %c0_12] : memref<32x128xf32, #tpu.memory_space<vmem>>, vector<32x128xf32>
      tpu.vector_store %arg6[%c0_11, %c0_12], %12 {strides = array<i32>} : memref<32x128xf32, #tpu.memory_space<vmem>>, vector<32x128xf32>,
    } else {
    }
    %c0 = arith.constant 0 : index
    %c0_1 = arith.constant 0 : index
    %3 = vector.load %arg6[%c0, %c0_1] : memref<32x128xf32, #tpu.memory_space<vmem>>, vector<32x128xf32>
    %c0_2 = arith.constant 0 : index
    %c0_3 = arith.constant 0 : index
    %4 = vector.load %arg3[%c0_2, %c0_3] : memref<32x256xbf16, #tpu.memory_space<vmem>>, vector<32x256xbf16>
    %c0_4 = arith.constant 0 : index
    %c0_5 = arith.constant 0 : index
    %5 = vector.load %arg4[%c0_4, %c0_5] : memref<256x128xbf16, #tpu.memory_space<vmem>>, vector<256x128xbf16>
    %cst = arith.constant dense<0.000000e+00> : vector<32x128xf32>
    %6 = tpu.matmul %4, %5, %cst {dimension_numbers = #tpu.dot_dimension_numbers<[1], [0], [0], [1], [0, 0, 1, 1], [], []>} : vector<32x256xbf16>, vector<256x128xbf16>, vector<32x128xf32> -> vector<32x128xf32>
    %7 = arith.addf %3, %6 : vector<32x128xf32>
    %c0_6 = arith.constant 0 : index
    %c0_7 = arith.constant 0 : index
    %8 = vector.load %arg6[%c0_6, %c0_7] : memref<32x128xf32, #tpu.memory_space<vmem>>, vector<32x128xf32>
    tpu.vector_store %arg6[%c0_6, %c0_7], %7 {strides = array<i32>} : memref<32x128xf32, #tpu.memory_space<vmem>>, vector<32x128xf32>,
    %c0_i32_8 = arith.constant 0 : i32
    %9 = arith.cmpi eq, %arg2, %c0_i32_8 : i32
    %10 = arith.extui %9 : i1 to i32
    %c0_i32_9 = arith.constant 0 : i32
    %11 = arith.cmpi ne, %10, %c0_i32_9 : i32
    scf.if %11 {
      %c0_10 = arith.constant 0 : index
      %c0_11 = arith.constant 0 : index
      %12 = vector.load %arg6[%c0_10, %c0_11] : memref<32x128xf32, #tpu.memory_space<vmem>>, vector<32x128xf32>
      %cst_12 = arith.constant 0.000000e+00 : f32
      %13 = vector.broadcast %cst_12 : f32 to vector<32x128xf32>
      %14 = arith.minimumf %12, %13 : vector<32x128xf32>
      %15 = math.exp %14 : vector<32x128xf32>
      %cst_13 = arith.constant 1.000000e+00 : f32
      %16 = vector.broadcast %cst_13 : f32 to vector<32x128xf32>
      %17 = arith.subf %15, %16 : vector<32x128xf32>
      %cst_14 = arith.constant 1.67326319 : f32
      %18 = vector.broadcast %cst_14 : f32 to vector<32x128xf32>
      %19 = arith.mulf %18, %17 : vector<32x128xf32>
      %cst_15 = arith.constant 0.000000e+00 : f32
      %20 = vector.broadcast %cst_15 : f32 to vector<32x128xf32>
      %21 = arith.cmpf ogt, %12, %20 : vector<32x128xf32>
      %22 = arith.select %21, %12, %19 : vector<32x128xi1>, vector<32x128xf32>
      %cst_16 = arith.constant 1.05070102 : f32
      %23 = vector.broadcast %cst_16 : f32 to vector<32x128xf32>
      %24 = arith.mulf %23, %22 : vector<32x128xf32>
      %c0_17 = arith.constant 0 : index
      %c0_18 = arith.constant 0 : index
      %25 = vector.load %arg5[%c0_17, %c0_18] : memref<32x128xf32, #tpu.memory_space<vmem>>, vector<32x128xf32>
      tpu.vector_store %arg5[%c0_17, %c0_18], %24 {strides = array<i32>} : memref<32x128xf32, #tpu.memory_space<vmem>>, vector<32x128xf32>,
    } else {
    }
    return
  }
  func.func @transform_0(%arg0: i32, %arg1: i32, %arg2: i32) -> (i32, i32) {
    %c0_i32 = arith.constant 0 : i32
    return %arg0, %arg2 : i32, i32
  }
  func.func @transform_1(%arg0: i32, %arg1: i32, %arg2: i32) -> (i32, i32) {
    %c0_i32 = arith.constant 0 : i32
    return %arg2, %arg1 : i32, i32
  }
  func.func @transform_2(%arg0: i32, %arg1: i32, %arg2: i32) -> (i32, i32) {
    %c0_i32 = arith.constant 0 : i32
    return %arg0, %arg1 : i32, i32
  }
}

</mosaic_0001>

<bundles_post_ra>
// kernel: gnn_extrapolation_forward.1
= control target key start
LH: loop header
LB: loop body
LE: loop exit
PB: predicated region body
PF: predicated region fallthrough
CT: control target
= control target key end

     0   :  { %s768_s9 = smov 0   ;;  %s770_s10 = smov 0   ;;  %s856_s0 = inlined_call_operand.vmem [shape: bf16[64,256], index: 0, kind: input, shape index: {}]   ;;  %s857_s1 = inlined_call_operand.vmem [shape: bf16[256,128], index: 1, kind: input, shape index: {}]   ;;  %s858_s2 = inlined_call_operand.vmem [shape: f32[64,128], index: 2, kind: output, shape index: {}]  }
   0x1   :  { %s772_s11 = smov 0  }
   0x2 LB: > { %s31_s12 = sadd.s32 1, %s747_s10  ;;  %p598_p0 = scmp.ge.s32.totalorder %s751_s11, 1  ;;  %s751_s11 = sphi %s772_s11, %s12_s11   ;;  %s747_s10 = sphi %s770_s10, %s860_s10   ;;  %s743_s9 = sphi %s768_s9, %s859_s9  }
   0x3   : > { %p33_p1 = scmp.ge.s32.totalorder %s31_s12, 2  ;;  %p158_p2 = scmp.lt.s32.totalorder %s751_s11, 3 }
   0x5   : > { %s862_s12 = smov (%p33_p1, %s31_s12), 0  ;;  %p159_p3 = pnand %p598_p0, %p158_p2 }
   0x6   : > { %v699_v0 = vld [vmem:[%s857_s1 + $0x40] sm:$0xff] (!%p159_p3)   ;;  %s599_s15 = sshll.u32 (!%p159_p3), %s743_s9, 2  ;;  %v701_v2 = vld [vmem:[%s857_s1 + $0x48] sm:$0xff] (!%p159_p3)   ;;  %v703_v4 = vld [vmem:[%s857_s1 + $0x50] sm:$0xff] (!%p159_p3)  }
   0x7   : > { %162 = sbr.rel (%p159_p3) target bundleno = 280 (0x118), region = 28  ;;  %v700_v1 = vld [vmem:[%s857_s1] sm:$0xff] (!%p159_p3)   ;;  %631 = vmatprep.subr.bf16.mxu0 (!%p159_p3), %v699_v0  ;;  %659 = vmatprep.subr.bf16.mxu1 (!%p159_p3), %v699_v0  ;;  %v702_v3 = vld [vmem:[%s857_s1 + $0x8] sm:$0xff] (!%p159_p3)   ;;  %p198_p4 = scmp.lt.s32.totalorder (!%p159_p3), %s599_s15, 7  ;;  %v704_v5 = vld [vmem:[%s857_s1 + $0x10] sm:$0xff] (!%p159_p3)  }
   0x8   : > { %632 = vmatpush3.bf16.msra.mxu0 (!%p159_p3), %v700_v1  ;;  %667 = vmatpush3.bf16.msra.mxu1 (!%p159_p3), %v700_v1  ;;  %v705_v6 = vld [vmem:[%s857_s1 + $0x58] sm:$0xff] (!%p159_p3)   ;;  %v707_v8 = vld [vmem:[%s857_s1 + $0x60] sm:$0xff] (!%p159_p3)   ;;  %v709_v10 = vld [vmem:[%s857_s1 + $0x68] sm:$0xff] (!%p159_p3)  }
   0x9   : > { %633 = vmatprep.subr.bf16.mxu0 (!%p159_p3), %v701_v2  ;;  %660 = vmatprep.subr.bf16.mxu1 (!%p159_p3), %v701_v2  ;;  %v706_v7 = vld [vmem:[%s857_s1 + $0x18] sm:$0xff] (!%p159_p3)   ;;  %v708_v9 = vld [vmem:[%s857_s1 + $0x20] sm:$0xff] (!%p159_p3)   ;;  %v710_v13 = vld [vmem:[%s857_s1 + $0x28] sm:$0xff] (!%p159_p3)  }
   0xa   : > { %v711_v14 = vld [vmem:[%s857_s1 + $0x70] sm:$0xff] (!%p159_p3)   ;;  %v713_v16 = vld [vmem:[%s857_s1 + $0x78] sm:$0xff] (!%p159_p3)  }
   0xb   : > { %v712_v15 = vld [vmem:[%s857_s1 + $0x30] sm:$0xff] (!%p159_p3)   ;;  %v714_v17 = vld [vmem:[%s857_s1 + $0x38] sm:$0xff] (!%p159_p3)  }
   0xc   : > { %634 = vmatpush3.bf16.msra.mxu0 (!%p159_p3), %v702_v3  ;;  %668 = vmatpush3.bf16.msra.mxu1 (!%p159_p3), %v702_v3 }
   0xd   : > { %635 = vmatprep.subr.bf16.mxu0 (!%p159_p3), %v703_v4  ;;  %661 = vmatprep.subr.bf16.mxu1 (!%p159_p3), %v703_v4 }
   0xe   : > { %s864_s15 = smov (!%p198_p4, %s599_s15), 7 }
   0xf   : > { %s630_s30 = sshll.u32 %s864_s15, 3 }
  0x10   : > { %636 = vmatpush3.bf16.msra.mxu0 %v704_v5  ;;  %669 = vmatpush3.bf16.msra.mxu1 %v704_v5  ;;  %s205_s7 = scalar_lea.vmem %s856_s0, %s630_s30  ;;  %s224_s28 = scalar_lea.vmem %s858_s2, %s630_s30 }
  0x11   : > { %637 = vmatprep.subr.bf16.mxu0 %v705_v6  ;;  %662 = vmatprep.subr.bf16.mxu1 %v705_v6  ;;  %v717_v11 = vld [vmem:[%s205_s7 + $0x4] ss:$8 sps:$4 sm:$0xff]   ;;  %v720_v12 = vld [vmem:[%s205_s7 + $0x14] ss:$8 sps:$4 sm:$0xff]   ;;  %v715_v18 = vld [vmem:[%s205_s7] ss:$8 sps:$4 sm:$0xff]  }
  0x12   : > { %423 = vmatprep.mubr.bf16.mxu0 %v717_v11  ;;  %431 = vmatprep.mubr.bf16.mxu1 %v720_v12  ;;  %v718_v19 = vld [vmem:[%s205_s7 + $0x10] ss:$8 sps:$4 sm:$0xff]  }
  0x14   : > { %638 = vmatpush3.bf16.msra.mxu0 %v706_v7  ;;  %670 = vmatpush3.bf16.msra.mxu1 %v706_v7 }
  0x15   : > { %639 = vmatprep.subr.bf16.mxu0 %v707_v8  ;;  %663 = vmatprep.subr.bf16.mxu1 %v707_v8 }
  0x18   : > { %640 = vmatpush3.bf16.msra.mxu0 %v708_v9  ;;  %671 = vmatpush3.bf16.msra.mxu1 %v708_v9 }
  0x19   : > { %641 = vmatprep.subr.bf16.mxu0 %v709_v10  ;;  %664 = vmatprep.subr.bf16.mxu1 %v709_v10 }
  0x1c   : > { %642 = vmatpush3.bf16.msra.mxu0 %v710_v13  ;;  %672 = vmatpush3.bf16.msra.mxu1 %v710_v13 }
  0x1d   : > { %643 = vmatprep.subr.bf16.mxu0 %v711_v14  ;;  %665 = vmatprep.subr.bf16.mxu1 %v711_v14 }
  0x20   : > { %644 = vmatpush3.bf16.msra.mxu0 %v712_v15  ;;  %673 = vmatpush3.bf16.msra.mxu1 %v712_v15 }
  0x21   : > { %645 = vmatprep.subr.bf16.mxu0 %v713_v16  ;;  %666 = vmatprep.subr.bf16.mxu1 %v713_v16 }
  0x24   : > { %646 = vmatpush3.bf16.msra.mxu0 %v714_v17  ;;  %674 = vmatpush3.bf16.msra.mxu1 %v714_v17 }
  0x27   : > { %424 = vmatmul.mubr.bf16.vlgmr.msra.gmra.mrb[0].mxu0 %v715_v18  ;;  %432 = vmatmul.mubr.bf16.vlgmr.msra.gmra.mrb[0].mxu1 %v718_v19 }
  0xfa   : > { %v647_v20 = vpop.f32.mrb[0].mxu0  ;;  %v653_v21 = vpop.f32.mrb[0].mxu1 }
  0xfb   : > { %v648_v22 = vpop.f32.mrb[1].mxu0  ;;  %v654_v23 = vpop.f32.mrb[1].mxu1 }
  0xfc   : > { %v649_v24 = vadd.f32 %v648_v22, %v647_v20  ;;  %v655_v25 = vadd.f32 %v654_v23, %v653_v21  ;;  %v650_v26 = vpop.f32.mrb[2].mxu0  ;;  %v656_v27 = vpop.f32.mrb[2].mxu1 }
  0xfd   : > { %v651_v28 = vpop.f32.mrb[3].mxu0  ;;  %v657_v29 = vpop.f32.mrb[3].mxu1 }
  0xfe   : > { %v455_v30 = vmin.f32 %v649_v24, 0.0  ;;  %v457_v31 = vmin.f32 %v655_v25, 0.0  ;;  %v652_v32 = vadd.f32 %v651_v28, %v650_v26  ;;  %v658_v33 = vadd.f32 %v657_v29, %v656_v27 }
  0xff   : > { %vm475_vm0 = vcmp.gt.f32.partialorder %v649_v24, 0.0  ;;  %vm477_vm1 = vcmp.gt.f32.partialorder %v655_v25, 0.0 }
 0x100   : > { %v459_v34 = vmul.f32 1.442695, %v455_v30  ;;  %v463_v35 = vmul.f32 1.442695, %v457_v31  ;;  %v456_v36 = vmin.f32 %v652_v32, 0.0  ;;  %v458_v37 = vmin.f32 %v658_v33, 0.0 }
 0x101   : > { %vm476_vm2 = vcmp.gt.f32.partialorder %v652_v32, 0.0  ;;  %vm478_vm3 = vcmp.gt.f32.partialorder %v658_v33, 0.0 }
 0x102   : > { %721 = vpow2.f32 %v459_v34  ;;  %v461_v38 = vmul.f32 1.442695, %v456_v36  ;;  %v465_v39 = vmul.f32 1.442695, %v458_v37 }
 0x103   : > { %723 = vpow2.f32 %v463_v35 }
 0x104   : > { %725 = vpow2.f32 %v461_v38 }
 0x105   : > { %727 = vpow2.f32 %v465_v39 }
 0x10c   : > { %v722_v40 = vpop.eup %721 }
 0x10d   : > { %v724_v41 = vpop.eup %723  ;;  %v624_v42 = vadd.f32 -1.0, %v722_v40 }
 0x10e   : > { %v626_v43 = vadd.f32 -1.0, %v724_v41  ;;  %v726_v44 = vpop.eup %725 }
 0x10f   : > { %v471_v45 = vmul.f32 1.6732632, %v624_v42  ;;  %v728_v46 = vpop.eup %727  ;;  %v625_v48 = vadd.f32 -1.0, %v726_v44 }
 0x110   : > { %v473_v47 = vmul.f32 1.6732632, %v626_v43  ;;  %v627_v50 = vadd.f32 -1.0, %v728_v46 }
 0x111   : > { %v479_v49 = vsel %vm475_vm0, %v649_v24, %v471_v45  ;;  %v472_v52 = vmul.f32 1.6732632, %v625_v48 }
 0x112   : > { %v483_v51 = vmul.f32 1.050701, %v479_v49  ;;  %v481_v53 = vsel %vm477_vm1, %v655_v25, %v473_v47  ;;  %v474_v54 = vmul.f32 1.6732632, %v627_v50 }
 0x113   : > { %v480_v55 = vsel %vm476_vm2, %v652_v32, %v472_v52  ;;  %v485_v58 = vmul.f32 1.050701, %v481_v53 }
 0x114   : > { %487 = vst [vmem:[%s224_s28] sm:$0xff] %v483_v51  ;;  %v484_v56 = vmul.f32 1.050701, %v480_v55  ;;  %v482_v57 = vsel %vm478_vm3, %v658_v33, %v474_v54 }
 0x115   : > { %v486_v59 = vmul.f32 1.050701, %v482_v57  ;;  %489 = vst [vmem:[%s224_s28 + $0x10] sm:$0xff] %v485_v58 }
 0x116   : > { %488 = vst [vmem:[%s224_s28 + $0x8] sm:$0xff] %v484_v56 }
 0x117   : > { %490 = vst [vmem:[%s224_s28 + $0x18] sm:$0xff] %v486_v59 }
 0x118 PF: > { %s12_s11 = sadd.s32 1, %s751_s11   ;;  %s859_s9 = smov %s747_s10 }
 0x119   : > { %p9_p5 = scmp.ge.s32.totalorder %s12_s11, 4   ;;  %s860_s10 = smov %s862_s12 }
 0x11b   :  { %11 = sbr.rel (!%p9_p5) target bundleno = 2 (0x2), region = 69 }

</bundles_post_ra>
